<compile_context>
chip_gen: v7x
topology: tpu7x:2x2x1
jax: 0.10.0
libtpu: 0.0.40
codegen_flags: <defaults>
</compile_context>

<pallas_src>
import functools

import jax
import jax.numpy as jnp
from jax.experimental import pallas as pl
from jax.experimental.pallas import tpu as pltpu


# ----------------------------- Pallas kernel ------------------------------ #
def encoder_kernel(xt_ref, at_ref, w1t_ref, b1t_ref, wht_ref, bht_ref, out_ref):
    # Transposed (lane-dense) dataflow on one diagonal block of the packed graph.
    #   xt  [F,  T]   X^T columns for this tile (T = graphs_per_tile * N)
    #   at  [T,  T]   A_hat^T diagonal block
    #   w1t [Hd, F]   W1^T            (resident)
    #   b1t [Hd, 1]   b1^T            (resident)
    #   wht [2L, Hd]  [Wmu|Wlv]^T     (resident, fused heads)
    #   bht [2L, 1]   [bmu|blv]^T     (resident)
    at = at_ref[...]

    # (X W1)^T = W1^T X^T                                     [Hd, T]
    xw1t = jnp.dot(w1t_ref[...], xt_ref[...],
                   preferred_element_type=jnp.float32)

    # H^T = relu((A (X W1))^T + b1^T) = relu((XW1)^T A^T + b1^T)
    ht = jnp.maximum(
        jnp.dot(xw1t, at, preferred_element_type=jnp.float32) + b1t_ref[...],
        0.0)                                                  # [Hd, T]

    # (A H)^T = H^T A^T                                       [Hd, T]
    aht = jnp.dot(ht, at, preferred_element_type=jnp.float32)

    # out^T = [Wmu|Wlv]^T (A H)^T + [bmu|blv]^T               [2L, T]  (128 lanes)
    out_ref[...] = (jnp.dot(wht_ref[...], aht,
                            preferred_element_type=jnp.float32) + bht_ref[...])


def encoder_pallas(xt, a_hat_t, w1t, b1t, wht, bht, *,
                   graphs_per_tile, nodes_per_graph):
    """xt: [F, B*N], a_hat_t: [B*N, B*N] (A_hat^T, block-diag), params resident.
    Returns out^T: [2L, B*N] f32."""
    f_dim, bn = xt.shape
    hd = w1t.shape[0]
    two_l = wht.shape[0]
    tile = graphs_per_tile * nodes_per_graph
    assert bn % tile == 0
    num_tiles = bn // tile

    return pl.pallas_call(
        encoder_kernel,
        out_shape=jax.ShapeDtypeStruct((two_l, bn), jnp.float32),
        grid_spec=pltpu.PrefetchScalarGridSpec(
            num_scalar_prefetch=0,
            grid=(num_tiles,),
            in_specs=[
                pl.BlockSpec((f_dim, tile), lambda i: (0, i)),   # X^T column tile
                pl.BlockSpec((tile, tile), lambda i: (i, i)),    # A_hat^T diag block
                pl.BlockSpec((hd, f_dim), lambda i: (0, 0)),     # W1^T     (resident)
                pl.BlockSpec((hd, 1), lambda i: (0, 0)),         # b1^T     (resident)
                pl.BlockSpec((two_l, hd), lambda i: (0, 0)),     # [Wmu|Wlv]^T (resident)
                pl.BlockSpec((two_l, 1), lambda i: (0, 0)),      # [bmu|blv]^T (resident)
            ],
            out_specs=pl.BlockSpec((two_l, tile), lambda i: (0, i)),
        ),
        compiler_params=pltpu.CompilerParams(
            dimension_semantics=("parallel",)),   # both TCs on v7x; no-op v5e/v6e
    )(xt, a_hat_t, w1t, b1t, wht, bht)
    # TODO(synk): for large N, switch to row-tiled A_hat with H staged through
    # scratch (and raise vmem_limit_bytes explicitly) — resident-A ceiling is
    # ~half on v7x's 64 MiB VMEM vs v5e/v6e.


# ------------------------------- JAX glue --------------------------------- #
def gcn_norm_blockdiag_t(edge_index_b, edge_attr_b, num_nodes):
    """Block-diagonal, symmetrically-normalized adjacency (TRANSPOSED) for the
    whole batch. Matches PyG GCNConv with edge weights: add self-loops (w=1),
    deg = scatter_add at target, norm_e = d^-1/2[src] * w_e * d^-1/2[dst],
    A_hat[dst, src] += norm_e  →  here we build A_hat^T[src, dst] += norm_e."""
    b, _, _ = edge_index_b.shape
    bn = b * num_nodes
    offs = (jnp.arange(b, dtype=edge_index_b.dtype) * num_nodes)[:, None]
    src = (edge_index_b[:, 0, :] + offs).reshape(-1)
    dst = (edge_index_b[:, 1, :] + offs).reshape(-1)
    w = edge_attr_b.reshape(-1).astype(jnp.float32)

    loop_idx = jnp.arange(bn, dtype=src.dtype)
    src = jnp.concatenate([src, loop_idx])
    dst = jnp.concatenate([dst, loop_idx])
    w = jnp.concatenate([w, jnp.ones((bn,), jnp.float32)])

    deg = jnp.zeros((bn,), jnp.float32).at[dst].add(w)
    deg_inv_sqrt = jnp.where(deg > 0, 1.0 / jnp.sqrt(deg), 0.0)
    norm = deg_inv_sqrt[src] * w * deg_inv_sqrt[dst]

    a_hat_t = jnp.zeros((bn, bn), jnp.float32).at[src, dst].add(norm)
    return a_hat_t


@functools.partial(jax.jit, static_argnames=("graphs_per_tile",))
def encoder_forward(x_b, edge_index_b, edge_attr_b,
                    w1, b1, wmu, bmu, wlv, blv, *, graphs_per_tile):
    """x_b: [B,N,F], edge_index_b: [B,2,E], edge_attr_b: [B,E]. Returns (mu, logvar)
    of shape [B,N,L] f32. All glue fuses into one XLA computation under jit."""
    B, N, F_ = x_b.shape
    L = wmu.shape[1]
    bn = B * N

    a_hat_t = gcn_norm_blockdiag_t(edge_index_b, edge_attr_b, N)   # [BN, BN]
    xt = x_b.reshape(bn, F_).T                                     # [F, BN]
    w1t = w1.T                                                     # [Hd, F]
    b1t = b1.reshape(-1, 1)                                        # [Hd, 1]
    wht = jnp.concatenate([wmu, wlv], axis=1).T                    # [2L, Hd]
    bht = jnp.concatenate([bmu, blv], axis=0).reshape(-1, 1)       # [2L, 1]

    out_t = encoder_pallas(xt, a_hat_t, w1t, b1t, wht, bht,
                           graphs_per_tile=graphs_per_tile,
                           nodes_per_graph=N)                      # [2L, BN]
    out = out_t.T.reshape(B, N, 2 * L)
    return out[..., :L], out[..., L:]


def gcn_norm_dense(edge_index, edge_attr, num_nodes):
    """Per-graph dense normalized adjacency (independent reference path)."""
    src, dst = edge_index[0], edge_index[1]
    w = edge_attr.reshape(-1).astype(jnp.float32)
    loop_idx = jnp.arange(num_nodes, dtype=src.dtype)
    src = jnp.concatenate([src, loop_idx])
    dst = jnp.concatenate([dst, loop_idx])
    w = jnp.concatenate([w, jnp.ones((num_nodes,), jnp.float32)])
    deg = jnp.zeros((num_nodes,), jnp.float32).at[dst].add(w)
    deg_inv_sqrt = jnp.where(deg > 0, 1.0 / jnp.sqrt(deg), 0.0)
    norm = deg_inv_sqrt[src] * w * deg_inv_sqrt[dst]
    return jnp.zeros((num_nodes, num_nodes), jnp.float32).at[dst, src].add(norm)


def glorot(key, shape):
    fan_in, fan_out = shape
    limit = jnp.sqrt(6.0 / (fan_in + fan_out))
    return jax.random.uniform(key, shape, jnp.float32, -limit, limit)


# --------------------------------- main ----------------------------------- #
if __name__ == "__main__":
    B = 16            # graphs packed block-diagonally (2 tiles of 8 graphs)
    N = 16            # nodes per graph
    E = 40            # edges per graph
    INPUT_DIM = 8
    HIDDEN_DIM = 32
    LATENT_DIM = 16
    GRAPHS_PER_TILE = 8   # 8*16 = 128 lane-dense columns per grid step (2 steps)

    key = jax.random.PRNGKey(0)
    k_x, k_src, k_dst, k_w, k1, k2, k3 = jax.random.split(key, 7)

    # batched inputs
    x_b = jax.random.normal(k_x, (B, N, INPUT_DIM), jnp.float32)
    edge_index_b = jnp.stack([
        jax.random.randint(k_src, (B, E), 0, N),
        jax.random.randint(k_dst, (B, E), 0, N),
    ], axis=1)                                           # [B, 2, E]
    edge_attr_b = jax.random.uniform(k_w, (B, E), jnp.float32, 0.1, 1.0)

    # shared parameters (GCNConv: weight [in, out], bias [out])
    w1 = glorot(k1, (INPUT_DIM, HIDDEN_DIM))
    b1 = jnp.zeros((HIDDEN_DIM,), jnp.float32)
    wmu = glorot(k2, (HIDDEN_DIM, LATENT_DIM))
    bmu = jnp.zeros((LATENT_DIM,), jnp.float32)
    wlv = glorot(k3, (HIDDEN_DIM, LATENT_DIM))
    blv = jnp.zeros((LATENT_DIM,), jnp.float32)

    mu, logvar = encoder_forward(x_b, edge_index_b, edge_attr_b,
                                 w1, b1, wmu, bmu, wlv, blv,
                                 graphs_per_tile=GRAPHS_PER_TILE)
    jax.block_until_ready((mu, logvar))

    # pure-JAX f32 reference (original per-graph op order, independent adjacency path)
    a_ref = jax.vmap(lambda ei, ea: gcn_norm_dense(ei, ea, N))(edge_index_b, edge_attr_b)
    h_ref = jnp.maximum(
        jnp.einsum('bij,bjh->bih', a_ref,
                   jnp.einsum('bnf,fh->bnh', x_b, w1)) + b1, 0.0)
    ah_ref = jnp.einsum('bij,bjh->bih', a_ref, h_ref)
    mu_ref = jnp.einsum('bih,hl->bil', ah_ref, wmu) + bmu
    lv_ref = jnp.einsum('bih,hl->bil', ah_ref, wlv) + blv

    assert jnp.allclose(mu, mu_ref, atol=5e-2, rtol=5e-2), "mu mismatch"
    assert jnp.allclose(logvar, lv_ref, atol=5e-2, rtol=5e-2), "logvar mismatch"
    rel_mu = jnp.linalg.norm(mu - mu_ref) / (jnp.linalg.norm(mu_ref) + 1e-8)
    rel_lv = jnp.linalg.norm(logvar - lv_ref) / (jnp.linalg.norm(lv_ref) + 1e-8)
    assert rel_mu < 3e-2 and rel_lv < 3e-2, "relative error too large"

    print("KERNEL_OK")
</pallas_src>

<mosaic_0001>
module attributes {stable_mosaic.version = 11 : i64} {
  func.func private @main(%arg0: i32) attributes {dimension_semantics = [#tpu.dimension_semantics<core_parallel>], iteration_bounds = array<i64: 2>, tpu.core_type = #tpu.core_type<sc_scalar_subcore>, window_params = []} {
    return
  }
}

module attributes {stable_mosaic.version = 11 : i64} {
  func.func private @main(%arg0: i32) attributes {dimension_semantics = [#tpu.dimension_semantics<core_parallel>], iteration_bounds = array<i64: 2>, tpu.core_type = #tpu.core_type<sc_scalar_subcore>, window_params = []} {
    return
  }
}

module attributes {stable_mosaic.version = 11 : i64} {
  func.func @encoder_kernel(%arg0: i32, %arg1: memref<8x128xf32, #tpu.memory_space<vmem>>, %arg2: memref<128x128xf32, #tpu.memory_space<vmem>>, %arg3: memref<32x8xf32, #tpu.memory_space<vmem>>, %arg4: memref<32x1xf32, #tpu.memory_space<vmem>>, %arg5: memref<32x32xf32, #tpu.memory_space<vmem>>, %arg6: memref<32x1xf32, #tpu.memory_space<vmem>>, %arg7: memref<32x128xf32, #tpu.memory_space<vmem>>) attributes {dimension_semantics = [#tpu.dimension_semantics<parallel>], iteration_bounds = array<i64: 2>, scalar_prefetch = 0 : i64, scratch_operands = 0 : i64, tpu.core_type = #tpu.core_type<tc>, window_params = [{transform_indices = @transform_0, window_bounds = array<i64: 8, 128>}, {transform_indices = @transform_1, window_bounds = array<i64: 128, 128>}, {pipeline_mode = #tpu.pipeline_mode<synchronous>, transform_indices = @transform_2, window_bounds = array<i64: 32, 8>}, {pipeline_mode = #tpu.pipeline_mode<synchronous>, transform_indices = @transform_3, window_bounds = array<i64: 32, 1>}, {pipeline_mode = #tpu.pipeline_mode<synchronous>, transform_indices = @transform_4, window_bounds = array<i64: 32, 32>}, {pipeline_mode = #tpu.pipeline_mode<synchronous>, transform_indices = @transform_5, window_bounds = array<i64: 32, 1>}, {transform_indices = @transform_6, window_bounds = array<i64: 32, 128>}]} {
    %c0 = arith.constant 0 : index
    %c0_0 = arith.constant 0 : index
    %0 = vector.load %arg2[%c0, %c0_0] : memref<128x128xf32, #tpu.memory_space<vmem>>, vector<128x128xf32>
    %c0_1 = arith.constant 0 : index
    %c0_2 = arith.constant 0 : index
    %1 = vector.load %arg3[%c0_1, %c0_2] : memref<32x8xf32, #tpu.memory_space<vmem>>, vector<32x8xf32>
    %c0_3 = arith.constant 0 : index
    %c0_4 = arith.constant 0 : index
    %2 = vector.load %arg1[%c0_3, %c0_4] : memref<8x128xf32, #tpu.memory_space<vmem>>, vector<8x128xf32>
    %cst = arith.constant dense<0.000000e+00> : vector<32x128xf32>
    %3 = tpu.matmul %1, %2, %cst {dimension_numbers = #tpu.dot_dimension_numbers<[1], [0], [0], [1], [0, 0, 1, 1], [], []>} : vector<32x8xf32>, vector<8x128xf32>, vector<32x128xf32> -> vector<32x128xf32>
    %cst_5 = arith.constant dense<0.000000e+00> : vector<32x128xf32>
    %4 = tpu.matmul %3, %0, %cst_5 {dimension_numbers = #tpu.dot_dimension_numbers<[1], [0], [0], [1], [0, 0, 1, 1], [], []>} : vector<32x128xf32>, vector<128x128xf32>, vector<32x128xf32> -> vector<32x128xf32>
    %c0_6 = arith.constant 0 : index
    %c0_7 = arith.constant 0 : index
    %5 = vector.load %arg4[%c0_6, %c0_7] : memref<32x1xf32, #tpu.memory_space<vmem>>, vector<32x1xf32>
    %6 = vector.broadcast %5 : vector<32x1xf32> to vector<32x128xf32>
    %7 = arith.addf %4, %6 : vector<32x128xf32>
    %cst_8 = arith.constant 0.000000e+00 : f32
    %8 = vector.broadcast %cst_8 : f32 to vector<32x128xf32>
    %9 = arith.maximumf %7, %8 : vector<32x128xf32>
    %cst_9 = arith.constant dense<0.000000e+00> : vector<32x128xf32>
    %10 = tpu.matmul %9, %0, %cst_9 {dimension_numbers = #tpu.dot_dimension_numbers<[1], [0], [0], [1], [0, 0, 1, 1], [], []>} : vector<32x128xf32>, vector<128x128xf32>, vector<32x128xf32> -> vector<32x128xf32>
    %c0_10 = arith.constant 0 : index
    %c0_11 = arith.constant 0 : index
    %11 = vector.load %arg5[%c0_10, %c0_11] : memref<32x32xf32, #tpu.memory_space<vmem>>, vector<32x32xf32>
    %cst_12 = arith.constant dense<0.000000e+00> : vector<32x128xf32>
    %12 = tpu.matmul %11, %10, %cst_12 {dimension_numbers = #tpu.dot_dimension_numbers<[1], [0], [0], [1], [0, 0, 1, 1], [], []>} : vector<32x32xf32>, vector<32x128xf32>, vector<32x128xf32> -> vector<32x128xf32>
    %c0_13 = arith.constant 0 : index
    %c0_14 = arith.constant 0 : index
    %13 = vector.load %arg6[%c0_13, %c0_14] : memref<32x1xf32, #tpu.memory_space<vmem>>, vector<32x1xf32>
    %14 = vector.broadcast %13 : vector<32x1xf32> to vector<32x128xf32>
    %15 = arith.addf %12, %14 : vector<32x128xf32>
    %c0_15 = arith.constant 0 : index
    %c0_16 = arith.constant 0 : index
    %16 = vector.load %arg7[%c0_15, %c0_16] : memref<32x128xf32, #tpu.memory_space<vmem>>, vector<32x128xf32>
    tpu.vector_store %arg7[%c0_15, %c0_16], %15 {strides = array<i32>} : memref<32x128xf32, #tpu.memory_space<vmem>>, vector<32x128xf32>,
    return
  }
  func.func @transform_0(%arg0: i32) -> (i32, i32) {
    %c0_i32 = arith.constant 0 : i32
    %c0_i32_0 = arith.constant 0 : i32
    return %c0_i32, %arg0 : i32, i32
  }
  func.func @transform_1(%arg0: i32) -> (i32, i32) {
    %c0_i32 = arith.constant 0 : i32
    return %arg0, %arg0 : i32, i32
  }
  func.func @transform_2(%arg0: i32) -> (i32, i32) {
    %c0_i32 = arith.constant 0 : i32
    %c0_i32_0 = arith.constant 0 : i32
    %c0_i32_1 = arith.constant 0 : i32
    return %c0_i32, %c0_i32_0 : i32, i32
  }
  func.func @transform_3(%arg0: i32) -> (i32, i32) {
    %c0_i32 = arith.constant 0 : i32
    %c0_i32_0 = arith.constant 0 : i32
    %c0_i32_1 = arith.constant 0 : i32
    return %c0_i32, %c0_i32_0 : i32, i32
  }
  func.func @transform_4(%arg0: i32) -> (i32, i32) {
    %c0_i32 = arith.constant 0 : i32
    %c0_i32_0 = arith.constant 0 : i32
    %c0_i32_1 = arith.constant 0 : i32
    return %c0_i32, %c0_i32_0 : i32, i32
  }
  func.func @transform_5(%arg0: i32) -> (i32, i32) {
    %c0_i32 = arith.constant 0 : i32
    %c0_i32_0 = arith.constant 0 : i32
    %c0_i32_1 = arith.constant 0 : i32
    return %c0_i32, %c0_i32_0 : i32, i32
  }
  func.func @transform_6(%arg0: i32) -> (i32, i32) {
    %c0_i32 = arith.constant 0 : i32
    %c0_i32_0 = arith.constant 0 : i32
    return %c0_i32, %arg0 : i32, i32
  }
}

</mosaic_0001>

<bundles_post_ra>
// kernel: encoder_forward.1
= control target key start
LH: loop header
LB: loop body
LE: loop exit
PB: predicated region body
PF: predicated region fallthrough
CT: control target
= control target key end

     0   :  { %11 = vsyncpa [#allocation3], 0  ;;  %s1519_s0 = inlined_call_operand.vmem [shape: f32[8,256], index: 0, kind: input, shape index: {}]   ;;  %s1520_s1 = inlined_call_operand.hbm [shape: f32[256,256], index: 1, kind: input, shape index: {}]   ;;  %s1521_s2 = inlined_call_operand.vmem [shape: f32[32,8], index: 2, kind: input, shape index: {}]   ;;  %s1522_s3 = inlined_call_operand.vmem [shape: f32[32,1], index: 3, kind: input, shape index: {}]   ;;  %s1523_s4 = inlined_call_operand.vmem [shape: f32[32,32], index: 4, kind: input, shape index: {}]   ;;  %s1524_s5 = inlined_call_operand.vmem [shape: f32[32,1], index: 5, kind: input, shape index: {}]   ;;  %s1525_s6 = inlined_call_operand.vmem [shape: f32[32,256], index: 6, kind: output, shape index: {}]  }
   0x1   :  { %13 = vsyncpa [#allocation3 + $0x1], 0  ;;  %s1298_s21 = smov 0   ;;  %s1300_s22 = smov 0  }
   0x2   :  { %s1302_s23 = smov 0   ;;  %s1304_s24 = smov 0  }
   0x3   :  { %s1306_s25 = smov 0   ;;  %s1308_s26 = smov 0  }
   0x4 LB: > { %s1327_s27 = sadd.s32 4294967295, %s1256_s26   ;;  %s1330_s28 = sadd.s32 1, %s1256_s26   ;;  %s1256_s26 = sphi %s1308_s26, %s1536_s26   ;;  %s1252_s25 = sphi %s1306_s25, %s1535_s25   ;;  %s1248_s24 = sphi %s1304_s24, %s1534_s24   ;;  %s1244_s23 = sphi %s1302_s23, %s1533_s23   ;;  %s1240_s22 = sphi %s1300_s22, %s1532_s22   ;;  %s1236_s21 = sphi %s1298_s21, %s1531_s21  }
   0x5   : > { %s49_s29 = ssub.s32 %s1256_s26, %s1330_s28  ;;  %s54_s30 = sadd.s32 1, %s1252_s25 }
   0x6   : > { %s51_s7 = sor.u32 %s49_s29, %s49_s29  ;;  %p61_p0 = scmp.ne.s32.totalorder %s1252_s25, %s1248_s24 }
   0x7   : > { %p52_p1 = scmp.eq.s32.totalorder %s51_s7, 0  ;;  %p62_p2 = scmp.eq.s32.totalorder %s1256_s26, 0 }
   0x8   : > { %p67_p3 = scmp.ne.s32.totalorder %s1248_s24, %s1244_s23  ;;  %p68_p4 = scmp.eq.s32.totalorder %s1327_s27, 0 }
   0x9   : > { %s1341_s8 = scalar_select %p52_p1, %s1252_s25, %s54_s30  }
   0xa   : > { %p1343_p5 = por %p62_p2, %p61_p0  ;;  %p1347_p6 = por %p68_p4, %p67_p3 }
   0xb   : > { %p162_p7 = scmp.eq.s32.totalorder %s49_s29, 0  ;;  %s164_s11 = sadd.s32 1, %s1240_s22 }
   0xc   : > { %p174_p8 = scmp.ne.s32.totalorder %s1240_s22, %s1236_s21  ;;  %p175_p9 = scmp.eq.s32.totalorder %s1327_s27, 1 }
   0xd   : > { %s1356_s12 = scalar_select %p162_p7, %s1240_s22, %s164_s11  }
   0xe   : > { %p1358_p10 = por %p175_p9, %p174_p8  ;;  %p1121_p11 = scmp.lt.s32.totalorder %s1256_s26, 2 }
   0xf   : > { %s220_s14 = sand.u32 1, %s1252_s25   ;;  %s887_s16 = sshll.u32 %s1256_s26, 5 }
  0x10   : > { %s1528_s13 = scalar_select %p1358_p10, 1, 0 }
  0x11   : > { %s867_s15 = sshll.u32 %s220_s14, 7  ;;  %s230_s17 = sadd.s32 %s1256_s26, %s887_s16 }
  0x12   : > { %s224_s18 = scalar_lea.vmem [#allocation2], %s867_s15  ;;  %s870_s20 = sshll.u32 %s230_s17, 7 }
  0x13   : > { %s233_s19 = sshll.u32 %s224_s18, 4  ;;  %s1371_s30 = scalar_lea.hbm %s1520_s1, %s870_s20  ;;  %s1366_s19 = int_to_ptr.vmem [resolvable:$true] %s233_s19 }
  0x14   : > { %p1375_p12 = pnand %p1121_p11, %p1343_p5  ;;  %s1379_s11 = scalar_lea.sflag [#allocation3], %s220_s14 }
  0x15   : > { %s1176_s15 = scalar_lea.hbm %s1371_s30, 2048  ;;  %s1181_s17 = scalar_lea.hbm %s1520_s1, 8192 }
  0x16   : > { %p1177_p13 = scmp.ne.s32.totalorder %s1371_s30, %s1176_s15  ;;  %p1178_p0 = pneg %p1375_p12 }
  0x17   : > { %p1182_p3 = scmp.lt.u32.totalorder %s1371_s30, %s1520_s1  ;;  %p1183_p4 = scmp.lt.u32.totalorder %s1181_s17, %s1176_s15 }
  0x18   : > { %p1179_p1 = pnand %p1178_p0, %p1177_p13  ;;  %p1185_p7 = scmp.lt.u32.totalorder %s1176_s15, %s1371_s30 }
  0x19   : > { %p1184_p5 = por %p1183_p4, %p1182_p3 }
  0x1a   : > { %p1180_p2 = pneg %p1179_p1 }
  0x1b   : > { %p1186_p8 = por %p1185_p7, %p1184_p5 }
  0x1d   : > { %p1187_p9 = pnand %p1186_p8, %p1180_p2 }
  0x1f   : > { %1190 = shalt.err (!%p1187_p9)
}
  0x20   : > { %s1191_s14 = scalar_lea.vmem %s1366_s19, 2048  ;;  %s1258_s23 = smov [#allocation2]  }
  0x21   : > { %p1192_p11 = scmp.ne.s32.totalorder %s1366_s19, %s1191_s14  ;;  %s1196_s29 = sshll.u32 %s1258_s23, 4  ;;  %s1197_s29 = int_to_ptr.vmem [resolvable:$false] %s1196_s29 }
  0x22   : > { %s1198_s9 = scalar_lea.vmem %s1197_s29, 4096  ;;  %p1199_p10 = scmp.lt.s32.totalorder %s1366_s19, %s1197_s29 }
  0x23   : > { %p1194_p13 = pnand %p1192_p11, %p1178_p0  ;;  %p1200_p3 = scmp.lt.s32.totalorder %s1198_s9, %s1191_s14 }
  0x25   : > { %p1195_p1 = pneg %p1194_p13  ;;  %p1201_p4 = por %p1200_p3, %p1199_p10 }
  0x27   : > { %p1202_p5 = pnand %p1201_p4, %p1195_p1 }
  0x29   : > { %1205 = shalt.err (!%p1202_p5)
}
  0x2a   : > { %s1259_s15 = smov 256   ;;  %s1260_s16 = smov 128  }
  0x2b   : > { %s1261_s17 = smov 8   ;;  %p871_p0 = scmp.ge.s32.totalorder %s1256_s26, 1 }
  0x2c   : > { %1120 = dma.hbm_to_vmem [thread:$0]  (!%p1375_p12), %s1371_s30, 2048, %s1366_s19, %s1379_s11, %s1259_s15, %s1260_s16, %s1261_s17  }
  0x2d   : > { %p241_p2 = scmp.lt.s32.totalorder %s1256_s26, 3 }
  0x2f   : > { %p242_p7 = pnand %p871_p0, %p241_p2 }
  0x30   : > { %s247_s18 = sand.u32 (!%p242_p7), 1, %s1248_s24  }
  0x31   : > { %245 = sbr.rel (%p242_p7) target bundleno = 945 (0x3b1), region = 44  ;;  %s872_s20 = sshll.u32 (!%p242_p7), %s247_s18, 7 }
  0x32   : > { %s248_s14 = scalar_lea.sflag (!%p242_p7), [#allocation3], %s247_s18  ;;  %s1410_s23 = scalar_lea.vmem (!%p242_p7), [#allocation2], %s872_s20 }
  0x38   : > { %1231 = dma.done.wait (%p1347_p6), %s248_s14, 2048  }
  0x39   : > { %1233 = vsyncadd (%p1347_p6), %s248_s14, 4294965248  ;;  %p283_p10 = scmp.lt.s32.totalorder %s1327_s27, 1  ;;  %vm309_vm0 = vcmask 64512   ;;  %v304_v1 = vld [vmem:[%s1521_s2] sm:$0xff]  ;;  %v305_v2 = vld [vmem:[%s1521_s2 + $0x8] sm:$0xff]  ;;  %v1262_v31 = vmov 0  }
  0x3a   : > { %943 = vmatprep.mubr.msk.f32.mxu0 %vm309_vm0, %v304_v1  ;;  %v306_v3 = vld [vmem:[%s1521_s2 + $0x10] sm:$0xff]  ;;  %v288_v4 = vld [vmem:[%s1410_s23] sm:$0xff]  ;;  %v289_v5 = vld [vmem:[%s1410_s23 + $0x8] sm:$0xff]  ;;  %1174 = vset.pattern.permute.xlu0 %v1262_v31  ;;  %vm633_vm1 = vcmask 261120   ;;  %s280_s10 = sand.u32 1, %s1236_s21   ;;  %p1530_p6 = scmp.ne.s32.totalorder %s1528_s13, 0 }
  0x3b   : > { %s284_s26 = scalar_select %p283_p10, %s1327_s27, 1  ;;  %v290_v6 = vld [vmem:[%s1410_s23 + $0x10] sm:$0xff]  ;;  %v291_v7 = vld [vmem:[%s1410_s23 + $0x18] sm:$0xff]  ;;  %v1039_v8 = vpack.c.bf16 %v289_v5, %v288_v4  ;;  %v292_v11 = vld [vmem:[%s1410_s23 + $0x20] sm:$0xff]  ;;  %1175 = vset.pattern.permute.xlu1 %v1262_v31 }
  0x3c   : > { %v1043_v9 = vpack.c.bf16 %v291_v7, %v290_v6  ;;  %v307_v10 = vld [vmem:[%s1521_s2 + $0x18] sm:$0xff]  ;;  %v293_v12 = vld [vmem:[%s1410_s23 + $0x28] sm:$0xff]  ;;  %v294_v14 = vld [vmem:[%s1410_s23 + $0x30] sm:$0xff]  ;;  %s873_s15 = sshll.u32 %s280_s10, 5  ;;  %s884_s21 = sshll.u32 (%p1530_p6), %s1327_s27, 3 }
  0x3d   : > { %s874_s19 = sshll.u32 %s284_s26, 3  ;;  %1040 = vmatprep.subr.bf16.mxu1 %v1039_v8  ;;  %v1047_v13 = vpack.c.bf16 %v293_v12, %v292_v11  ;;  %v295_v15 = vld [vmem:[%s1410_s23 + $0x38] sm:$0xff]  ;;  %v296_v17 = vld [vmem:[%s1410_s23 + $0x40] sm:$0xff]  ;;  %v297_v18 = vld [vmem:[%s1410_s23 + $0x48] sm:$0xff]  ;;  %s282_s16 = scalar_lea.vmem [#allocation4], %s873_s15 }
  0x3e   : > { %s286_s11 = scalar_lea.vmem %s1519_s0, %s874_s19  ;;  %1042 = vmatpush3.bf16.msra.mxu1 %v1039_v8  ;;  %v1051_v16 = vpack.c.bf16 %v295_v15, %v294_v14  ;;  %v1055_v19 = vpack.c.bf16 %v297_v18, %v296_v17  ;;  %v298_v20 = vld [vmem:[%s1410_s23 + $0x50] sm:$0xff]  ;;  %v299_v21 = vld [vmem:[%s1410_s23 + $0x58] sm:$0xff]  ;;  %v300_v23 = vld [vmem:[%s1410_s23 + $0x60] sm:$0xff]  ;;  %s743_s20 = scalar_lea.vmem (%p1530_p6), %s1525_s6, %s884_s21 }
  0x3f   : > { %v308_v0 = vld [vmem:[%s286_s11] sm:$0xff]  ;;  %1044 = vmatprep.subr.bf16.mxu1 %v1043_v9  ;;  %v1059_v22 = vpack.c.bf16 %v299_v21, %v298_v20  ;;  %v301_v24 = vld [vmem:[%s1410_s23 + $0x68] sm:$0xff]  ;;  %v302_v26 = vld [vmem:[%s1410_s23 + $0x70] sm:$0xff] }
  0x40   : > { %941 = vmatprep.subr.mxu0 %v308_v0  ;;  %v1063_v25 = vpack.c.bf16 %v301_v24, %v300_v23  ;;  %v303_v27 = vld [vmem:[%s1410_s23 + $0x78] sm:$0xff]  ;;  %v407_v29 = vld [vmem:[%s1522_s3] sm:$0xff]  ;;  %v409_v30 = vld [vmem:[%s1522_s3 + $0x10] sm:$0xff] }
  0x41   : > { %942 = vmatpush3.msra.mxu0 %v308_v0  ;;  %v1067_v28 = vpack.c.bf16 %v303_v27, %v302_v26  ;;  %413 = vperm.xlu0 %1174, %v407_v29   ;;  %v408_v32 = vld [vmem:[%s1522_s3 + $0x8] sm:$0xff]  ;;  %v410_v33 = vld [vmem:[%s1522_s3 + $0x18] sm:$0xff]  ;;  %v609_v34 = vld [vmem:[%s1524_s5] sm:$0xff] }
  0x42   : > { %944 = vmatmul.mubr.msk.f32.vlgmr.msra.gmra.mrb[0].mxu0 %vm309_vm0, %v305_v2  ;;  %1072 = vmatprep.subr.bf16.mxu0 %v1039_v8  ;;  %v610_v35 = vld [vmem:[%s1524_s5 + $0x8] sm:$0xff]  ;;  %v611_v36 = vld [vmem:[%s1524_s5 + $0x10] sm:$0xff]  ;;  %v612_v37 = vld [vmem:[%s1524_s5 + $0x18] sm:$0xff] }
  0x43   : > { %946 = vmatprep.mubr.msk.f32.mxu0 %vm309_vm0, %v306_v3  ;;  %1074 = vmatpush3.bf16.msra.mxu0 %v1039_v8  ;;  %v605_v58 = vld [vmem:[%s1523_s4] sm:$0xff]  ;;  %v607_v59 = vld [vmem:[%s1523_s4 + $0x10] sm:$0xff]  ;;  %v606_v2 = vld [vmem:[%s1523_s4 + $0x8] sm:$0xff] }
  0x44   : > { %1076 = vmatprep.subr.bf16.mxu0 %v1043_v9  ;;  %1046 = vmatpush3.bf16.msra.mxu1 %v1043_v9  ;;  %v608_v3 = vld [vmem:[%s1523_s4 + $0x18] sm:$0xff] }
  0x45   : > { %1048 = vmatprep.subr.bf16.mxu1 %v1047_v13  ;;  %423 = vperm.xlu1 %1175, %v409_v30  }
  0x46   : > { %947 = vmatmul.mubr.msk.f32.gmra.mrb[2].mxu0 %vm309_vm0, %v307_v10  ;;  %418 = vperm.xlu0 %1174, %v408_v32  }
  0x47   : > { %1078 = vmatpush3.bf16.msra.mxu0 %v1043_v9 }
  0x48   : > { %1080 = vmatprep.subr.bf16.mxu0 %v1047_v13  ;;  %1050 = vmatpush3.bf16.msra.mxu1 %v1047_v13 }
  0x49   : > { %1052 = vmatprep.subr.bf16.mxu1 %v1051_v16  ;;  %428 = vperm.xlu1 %1175, %v410_v33  }
  0x4a   : > { %615 = vperm.xlu0 %1174, %v609_v34  }
  0x4b   : > { %1082 = vmatpush3.bf16.msra.mxu0 %v1047_v13 }
  0x4c   : > { %1084 = vmatprep.subr.bf16.mxu0 %v1051_v16  ;;  %1054 = vmatpush3.bf16.msra.mxu1 %v1051_v16 }
  0x4d   : > { %1056 = vmatprep.subr.bf16.mxu1 %v1055_v19  ;;  %620 = vperm.xlu1 %1175, %v610_v35  }
  0x4e   : > { %625 = vperm.xlu0 %1174, %v611_v36  }
  0x4f   : > { %1086 = vmatpush3.bf16.msra.mxu0 %v1051_v16 }
  0x50   : > { %1088 = vmatprep.subr.bf16.mxu0 %v1055_v19  ;;  %1058 = vmatpush3.bf16.msra.mxu1 %v1055_v19 }
  0x51   : > { %1060 = vmatprep.subr.bf16.mxu1 %v1059_v22  ;;  %630 = vperm.xlu1 %1175, %v612_v37  }
  0x53   : > { %1090 = vmatpush3.bf16.msra.mxu0 %v1055_v19 }
  0x54   : > { %1092 = vmatprep.subr.bf16.mxu0 %v1059_v22  ;;  %1062 = vmatpush3.bf16.msra.mxu1 %v1059_v22 }
  0x55   : > { %1064 = vmatprep.subr.bf16.mxu1 %v1063_v25 }
  0x57   : > { %1094 = vmatpush3.bf16.msra.mxu0 %v1059_v22 }
  0x58   : > { %1096 = vmatprep.subr.bf16.mxu0 %v1063_v25  ;;  %1066 = vmatpush3.bf16.msra.mxu1 %v1063_v25 }
  0x59   : > { %1068 = vmatprep.subr.bf16.mxu1 %v1067_v28 }
  0x5b   : > { %1098 = vmatpush3.bf16.msra.mxu0 %v1063_v25 }
  0x5c   : > { %1100 = vmatprep.subr.bf16.mxu0 %v1067_v28  ;;  %1070 = vmatpush3.bf16.msra.mxu1 %v1067_v28 }
  0x5f   : > { %1102 = vmatpush3.bf16.msra.mxu0 %v1067_v28 }
  0xc0   : > { %v414_v42 = vpop.permute.xlu0 %413 }
  0xc4   : > { %v424_v43 = vpop.permute.xlu1 %423 }
  0xc5   : > { %v419_v44 = vpop.permute.xlu0 %418 }
  0xc8   : > { %v429_v49 = vpop.permute.xlu1 %428 }
  0xc9   : > { %v616_v4 = vpop.permute.xlu0 %615 }
  0xcc   : > { %v621_v5 = vpop.permute.xlu1 %620 }
  0xcd   : > { %v626_v6 = vpop.permute.xlu0 %625 }
  0xd0   : > { %v631_v7 = vpop.permute.xlu1 %630 }
 0x115   : > { %v945_v38 = vpop.f32.mrb[0].mxu0 }
 0x116   : > { %v388_v39 = vpop.f32.mrb[1].mxu0 }
 0x117   : > { %981 = vmatprep.mubr.f32.mxu1 %v388_v39 }
 0x118   : > { %982 = vmatmul.mubr.f32.vlgmr.msra.gmra.mrb[0].mxu1 %v945_v38 }
 0x119   : > { %v948_v40 = vpop.f32.mrb[2].mxu0 }
 0x11a   : > { %v398_v41 = vpop.f32.mrb[3].mxu0 }
 0x11b   : > { %984 = vmatprep.mubr.f32.mxu1 %v398_v41 }
 0x11c   : > { %985 = vmatmul.mubr.f32.gmra.mrb[2].mxu1 %v948_v40 }
 0x11d   : > { %1036 = vmatprep.mubr.msk.f32.mxu1 %vm633_vm1, %v607_v59 }
 0x1eb   : > { %v983_v45 = vpop.f32.mrb[0].mxu1 }
 0x1ec   : > { %v503_v46 = vadd.f32 %v983_v45, %v419_v44  ;;  %v497_v47 = vpop.f32.mrb[1].mxu1 }
 0x1ed   : > { %v498_v48 = vadd.f32 %v497_v47, %v414_v42 }
 0x1ee   : > { %v517_v52 = vmax.f32 %v503_v46, 0.0 }
 0x1ef   : > { %v516_v50 = vmax.f32 %v498_v48, 0.0  ;;  %v986_v51 = vpop.f32.mrb[2].mxu1 }
 0x1f0   : > { %v513_v53 = vadd.f32 %v986_v51, %v429_v49  ;;  %v507_v54 = vpop.f32.mrb[3].mxu1 }
 0x1f1   : > { %v508_v55 = vadd.f32 %v507_v54, %v424_v43  ;;  %1019 = vmatprep.mubr.f32.mxu0 %v516_v50 }
 0x1f2   : > { %1020 = vmatmul.mubr.f32.vlgmr.msra.gmra.mrb[4].mxu0 %v517_v52  ;;  %v519_v57 = vmax.f32 %v513_v53, 0.0 }
 0x1f3   : > { %v518_v56 = vmax.f32 %v508_v55, 0.0 }
 0x1f5   : > { %1022 = vmatprep.mubr.f32.mxu0 %v518_v56 }
 0x1f6   : > { %1023 = vmatmul.mubr.f32.gmra.mrb[6].mxu0 %v519_v57 }
 0x1f7   : > { %1033 = vmatprep.mubr.msk.f32.mxu0 %vm633_vm1, %v605_v58 }
 0x2c5   : > { %v1021_v60 = vpop.f32.mrb[4].mxu0 }
 0x2c6   : > { %v586_v61 = vpop.f32.mrb[5].mxu0 }
 0x2c7   : > { %v1103_v62 = vpack.c.bf16 %v1021_v60, %v586_v61 }
 0x2c9   : > { %v1024_v63 = vpop.f32.mrb[6].mxu0  ;;  %1104 = vmatprep.subr.bf16.mxu0 %v1103_v62  ;;  %1111 = vmatprep.subr.bf16.mxu1 %v1103_v62 }
 0x2ca   : > { %v596_v0 = vpop.f32.mrb[7].mxu0  ;;  %1106 = vmatpush3.bf16.msra.mxu0 %v1103_v62  ;;  %1113 = vmatpush3.bf16.msra.mxu1 %v1103_v62 }
 0x2cb   : > { %v1107_v1 = vpack.c.bf16 %v1024_v63, %v596_v0 }
 0x2cd   : > { %1108 = vmatprep.subr.bf16.mxu0 %v1107_v1  ;;  %1112 = vmatprep.subr.bf16.mxu1 %v1107_v1 }
 0x2ce   : > { %1110 = vmatpush3.bf16.msra.mxu0 %v1107_v1  ;;  %1114 = vmatpush3.bf16.msra.mxu1 %v1107_v1 }
 0x2d1   : > { %1034 = vmatmul.mubr.msk.f32.vlgmr.msra.gmra.mrb[8].mxu0 %vm633_vm1, %v606_v2  ;;  %1037 = vmatmul.mubr.msk.f32.vlgmr.msra.gmra.mrb[4].mxu1 %vm633_vm1, %v608_v3 }
 0x3a2   : > { %741 = sbr.rel (!%p1530_p6) target bundleno = 945 (0x3b1), region = 52 }
 0x3a4   : > { %v1035_v8 = vpop.f32.mrb[8].mxu0  ;;  %v1038_v9 = vpop.f32.mrb[4].mxu1 }
 0x3a5   : > { %v718_v10 = vadd.f32 %v1035_v8, %v621_v5  ;;  %v728_v11 = vadd.f32 %v1038_v9, %v631_v7  ;;  %v712_v12 = vpop.f32.mrb[9].mxu0  ;;  %v722_v13 = vpop.f32.mrb[5].mxu1 }
 0x3a6   : > { %v713_v14 = vadd.f32 %v712_v12, %v616_v4  ;;  %v723_v15 = vadd.f32 %v722_v13, %v626_v6 }
 0x3a7   : > { %732 = vst [vmem:[%s282_s16 + $0x8] sm:$0xff] %v718_v10  ;;  %734 = vst [vmem:[%s282_s16 + $0x18] sm:$0xff] %v728_v11 }
 0x3a8   : > { %731 = vst [vmem:[%s282_s16] sm:$0xff] %v713_v14  ;;  %733 = vst [vmem:[%s282_s16 + $0x10] sm:$0xff] %v723_v15 }
 0x3ae   : > { %v779_v17 = vld [vmem:[%s282_s16 + $0x8] sm:$0xff]  ;;  %v783_v19 = vld [vmem:[%s282_s16 + $0x18] sm:$0xff] }
 0x3af   : > { %v777_v16 = vld [vmem:[%s282_s16] sm:$0xff]  ;;  %v781_v18 = vld [vmem:[%s282_s16 + $0x10] sm:$0xff]  ;;  %780 = vst [vmem:[%s743_s20 + $0x10] sm:$0xff] %v779_v17  ;;  %784 = vst [vmem:[%s743_s20 + $0x30] sm:$0xff] %v783_v19 }
 0x3b0   : > { %778 = vst [vmem:[%s743_s20] sm:$0xff] %v777_v16  ;;  %782 = vst [vmem:[%s743_s20 + $0x20] sm:$0xff] %v781_v18 }
 0x3b1 PF: > { %p16_p12 = scmp.ge.s32.totalorder %s1330_s28, 4   ;;  %s1531_s21 = smov %s1240_s22 }
 0x3b2   : > { %s1532_s22 = smov %s1356_s12  ;;  %s1533_s23 = smov %s1248_s24 }
 0x3b3   : > { %s1534_s24 = smov %s1252_s25  ;;  %s1535_s25 = smov %s1341_s8 }
 0x3b4   : > { %s1536_s26 = smov %s1330_s28  ;;  %18 = sbr.rel (!%p16_p12) target bundleno = 4 (0x4), region = 125 }
 0x3bb   :  { %800 = vsyncpa [#allocation3], 1 }
 0x3bc   :  { %802 = vsyncpa [#allocation3 + $0x1], 1 }

</bundles_post_ra>
